<compile_context>
chip_gen: v7x
topology: tpu7x:2x2x1
jax: 0.10.0
libtpu: 0.0.40
codegen_flags: <defaults>
</compile_context>

<pallas_src>
import jax
import jax.numpy as jnp
from jax.experimental import pallas as pl
from jax.experimental.pallas import tpu as pltpu


def _pooling_attn_kernel(x_ref, mask_ref, q_ref, out_ref, attn_ref):
    """One grid step == one tile of TB batch elements.

    x_ref:    (TB, L, E)  native dtype
    mask_ref: (TB, 1, L)  f32, 1.0 = valid token
    q_ref:    (H,  E)     native dtype (shared across the grid)
    out_ref:  (TB, H, E)  pooled output (x dtype)
    attn_ref: (TB, H, L)  attention weights, lane-dense (L on lanes)
    """
    tb, L, E = x_ref.shape
    H = q_ref.shape[0]

    x = x_ref[...]                        # (TB, L, E), native dtype
    mask = mask_ref[...]                  # (TB, 1, L), f32
    q = q_ref[...]                        # (H, E), native dtype

    # Broadcast the query across the batch tile once (hoisted, tiny) so the
    # batched MXU matmul produces scores directly in (TB, H, L): L on lanes,
    # no in-kernel transpose needed.
    q_b = jnp.broadcast_to(q[None, :, :], (tb, H, E))
    scores = jnp.einsum("bhe,ble->bhl", q_b, x,
                        preferred_element_type=jnp.float32)     # (TB, H, L) f32

    # masked_fill(pad_mask.unsqueeze(-1) == 0, -1e9), transposed layout.
    scores = jnp.where(mask > 0.5, scores, jnp.float32(-1.0e9))

    # Numerically-stable softmax over the sequence axis (= lane axis here).
    m = jnp.max(scores, axis=-1, keepdims=True)                 # (TB, H, 1), XLU reduce
    e = jnp.exp(scores - m)                                     # EUP
    denom = jnp.sum(e, axis=-1, keepdims=True)                  # (TB, H, 1)
    w = e * pl.reciprocal(denom, approx=True)                   # (TB, H, L), lane-dense

    attn_ref[...] = w.astype(attn_ref.dtype)

    # pooled[b] = w[b] @ x[b] : (H, L) x (L, E) -> (H, E), one batched MXU matmul.
    # Feed the MXU weights in x's dtype (bf16 stays bf16), accumulate in f32.
    pooled = jnp.einsum("bhl,ble->bhe", w.astype(x.dtype), x,
                        preferred_element_type=jnp.float32)
    out_ref[...] = pooled.astype(out_ref.dtype)


def _vmem_capacity_bytes():
    """Physical VMEM of the running chip; conservative (v7x) fallback."""
    try:
        cap = getattr(pltpu.get_tpu_info(), "vmem_capacity_bytes", None)
        if cap:
            return int(cap)
    except Exception:
        pass
    return 64 * 1024 * 1024


def _pick_batch_tile(B, L, E, H, x_bytes, vmem_budget_bytes):
    """Largest batch tile whose double-buffered working set fits the budget."""
    per_elem = (
        2 * L * E * x_bytes        # x tile, double-buffered
        + 2 * L * 4                # pad-mask tile (f32), double-buffered
        + 2 * H * L * x_bytes      # attention-weights output tile, double-buffered
        + 2 * H * E * x_bytes      # pooled output tile, double-buffered
        + 4 * H * L * 4            # f32 scores / exp / weights intermediates
        + 2 * H * E * 4            # broadcast query + f32 pooled intermediate
    )
    tb = max(1, int(vmem_budget_bytes // max(per_elem, 1)))
    tb = min(tb, B)
    if B >= 2:
        # Keep at least two grid steps so v7x's two TensorCores both get work.
        tb = min(tb, (B + 1) // 2)
    return tb


def pooling_attention(x, pad_mask, query, *, batch_tile=None):
    """x: (B, L, E); pad_mask: (B, L), nonzero = valid token; query: (H, E).

    Returns (pooled.reshape(B, H*E), attention_weights (B, L, H)), in x.dtype,
    matching PoolingAttention.forward.
    """
    B, L, E = x.shape
    H = query.shape[0]
    x_bytes = jnp.dtype(x.dtype).itemsize

    vmem_cap = _vmem_capacity_bytes()
    if batch_tile is None:
        # TODO(synk): add sequence (L) tiling with an online softmax for configs
        # where a single batch element's double-buffered (L, E) slab exceeds the
        # v7x 64 MiB VMEM budget; currently a full sequence must fit per element.
        tb = _pick_batch_tile(B, L, E, H, x_bytes, int(vmem_cap * 0.45))
    else:
        tb = int(batch_tile)

    q = jnp.asarray(query, x.dtype)                         # query streamed in x's dtype
    mask = (pad_mask != 0).astype(jnp.float32).reshape(B, 1, L)

    # Pad the batch so tb divides it; padded rows are fully masked and sliced off.
    Bp = ((B + tb - 1) // tb) * tb
    if Bp != B:
        x = jnp.pad(x, ((0, Bp - B), (0, 0), (0, 0)))
        mask = jnp.pad(mask, ((0, Bp - B), (0, 0), (0, 0)))

    pooled, attn_hl = pl.pallas_call(
        _pooling_attn_kernel,
        out_shape=(jax.ShapeDtypeStruct((Bp, H, E), x.dtype),
                   jax.ShapeDtypeStruct((Bp, H, L), x.dtype)),
        grid_spec=pltpu.PrefetchScalarGridSpec(
            num_scalar_prefetch=0,
            grid=(Bp // tb,),
            in_specs=[
                pl.BlockSpec((tb, L, E), lambda b: (b, 0, 0)),   # x tile (native dtype)
                pl.BlockSpec((tb, 1, L), lambda b: (b, 0, 0)),   # pad-mask tile
                pl.BlockSpec((H, E), lambda b: (0, 0)),          # shared query
            ],
            out_specs=[
                pl.BlockSpec((tb, H, E), lambda b: (b, 0, 0)),   # pooled output
                pl.BlockSpec((tb, H, L), lambda b: (b, 0, 0)),   # attn weights (lane-dense)
            ],
        ),
        compiler_params=pltpu.CompilerParams(
            dimension_semantics=("parallel",),        # batch tiles split across TCs on v7x
            vmem_limit_bytes=int(vmem_cap * 0.85),    # unlock the larger batch tile
        ),
    )(x, mask, q)

    pooled = pooled[:B].reshape(B, H * E)             # == weighted_sum.view(B, -1)
    attn = jnp.swapaxes(attn_hl[:B], 1, 2)            # kernel emits (B,H,L); module returns (B,L,H)
    return pooled, attn


def _reference(x, pad_mask, query):
    """Pure-JAX replica of the PyTorch PoolingAttention forward (f32)."""
    B = x.shape[0]
    xf = x.astype(jnp.float32)
    qf = query.astype(jnp.float32)
    scores = jnp.einsum("ble,he->blh", xf, qf)
    scores = jnp.where(pad_mask[:, :, None] == 0, jnp.float32(-1.0e9), scores)
    w = jax.nn.softmax(scores, axis=1)
    pooled = jnp.einsum("blh,ble->bhe", w, xf)
    return pooled.reshape(B, -1), w


if __name__ == "__main__":
    B, L, E, H = 2, 8, 32, 4

    key = jax.random.PRNGKey(0)
    k_q, k_x = jax.random.split(key)
    # learnable query parameter (num_heads, embedding_dim); init scale does not
    # affect forward semantics (module uses xavier_uniform_).
    query = jax.random.normal(k_q, (H, E), jnp.float32) * 0.1
    x = jax.random.normal(k_x, (B, L, E), jnp.float32)
    # 1.0 = valid token, 0.0 = padding (module masks where pad_mask == 0)
    pad_mask = jnp.array([[1, 1, 1, 1, 1, 0, 0, 0],
                          [1, 1, 1, 1, 1, 1, 1, 0]], jnp.float32)

    out, attn = jax.block_until_ready(pooling_attention(x, pad_mask, query))
    ref_out, ref_attn = _reference(x, pad_mask, query)

    assert out.shape == (B, H * E) and attn.shape == (B, L, H)
    # Tolerance covers the EUP approximate reciprocal used for the softmax
    # normalization; all other math is f32 with f32 accumulation.
    assert jnp.allclose(out, ref_out, atol=2e-3, rtol=2e-3)
    assert jnp.allclose(attn, ref_attn, atol=2e-3, rtol=2e-3)

    # Native-bf16 streaming path (no host upcast; f32 accumulation in-kernel).
    out_b, attn_b = jax.block_until_ready(
        pooling_attention(x.astype(jnp.bfloat16), pad_mask,
                          query.astype(jnp.bfloat16)))
    assert out_b.dtype == jnp.bfloat16 and attn_b.dtype == jnp.bfloat16
    assert jnp.allclose(out_b.astype(jnp.float32), ref_out, atol=5e-2, rtol=5e-2)

    print("KERNEL_OK")
</pallas_src>

<mosaic_0001>
module attributes {stable_mosaic.version = 11 : i64} {
  func.func @_pooling_attn_kernel(%arg0: i32, %arg1: memref<1x8x32xf32, #tpu.memory_space<vmem>>, %arg2: memref<1x1x8xf32, #tpu.memory_space<vmem>>, %arg3: memref<4x32xf32, #tpu.memory_space<vmem>>, %arg4: memref<1x4x32xf32, #tpu.memory_space<vmem>>, %arg5: memref<1x4x8xf32, #tpu.memory_space<vmem>>) attributes {dimension_semantics = [#tpu.dimension_semantics<parallel>], iteration_bounds = array<i64: 2>, scalar_prefetch = 0 : i64, scratch_operands = 0 : i64, tpu.core_type = #tpu.core_type<tc>, window_params = [{transform_indices = @transform_0, window_bounds = array<i64: 1, 8, 32>}, {transform_indices = @transform_1, window_bounds = array<i64: 1, 1, 8>}, {pipeline_mode = #tpu.pipeline_mode<synchronous>, transform_indices = @transform_2, window_bounds = array<i64: 4, 32>}, {transform_indices = @transform_3, window_bounds = array<i64: 1, 4, 32>}, {transform_indices = @transform_4, window_bounds = array<i64: 1, 4, 8>}]} {
    %c0 = arith.constant 0 : index
    %c0_0 = arith.constant 0 : index
    %c0_1 = arith.constant 0 : index
    %0 = vector.load %arg1[%c0, %c0_0, %c0_1] : memref<1x8x32xf32, #tpu.memory_space<vmem>>, vector<1x8x32xf32>
    %c0_2 = arith.constant 0 : index
    %c0_3 = arith.constant 0 : index
    %c0_4 = arith.constant 0 : index
    %1 = vector.load %arg2[%c0_2, %c0_3, %c0_4] : memref<1x1x8xf32, #tpu.memory_space<vmem>>, vector<1x1x8xf32>
    %c0_5 = arith.constant 0 : index
    %c0_6 = arith.constant 0 : index
    %2 = vector.load %arg3[%c0_5, %c0_6] : memref<4x32xf32, #tpu.memory_space<vmem>>, vector<4x32xf32>
    %3 = vector.shape_cast %2 : vector<4x32xf32> to vector<1x4x32xf32>
    "tpu.trace_start"() <{level = 10 : i32, message = "bhe,ble->bhl"}> : () -> ()
    %cst = arith.constant dense<0.000000e+00> : vector<1x4x8xf32>
    %4 = tpu.matmul %3, %0, %cst {dimension_numbers = #tpu.dot_dimension_numbers<[2], [2], [1], [1], [0, 0, 0, 1, 1, 1], [0], [0]>} : vector<1x4x32xf32>, vector<1x8x32xf32>, vector<1x4x8xf32> -> vector<1x4x8xf32>
    %cst_7 = arith.constant 5.000000e-01 : f32
    "tpu.trace_stop"() : () -> ()
    %5 = vector.broadcast %cst_7 : f32 to vector<1x1x8xf32>
    %6 = arith.cmpf ogt, %1, %5 : vector<1x1x8xf32>
    %cst_8 = arith.constant -1.000000e+09 : f32
    %7 = vector.shape_cast %6 : vector<1x1x8xi1> to vector<1x1x8xi1>
    %8 = vector.broadcast %7 : vector<1x1x8xi1> to vector<1x4x8xi1>
    %9 = vector.broadcast %cst_8 : f32 to vector<1x4x8xf32>
    %10 = arith.select %8, %4, %9 : vector<1x4x8xi1>, vector<1x4x8xf32>
    %cst_9 = arith.constant dense<0xFF800000> : vector<1x4xf32>
    %11 = vector.multi_reduction <maximumf>, %10, %cst_9 [2] : vector<1x4x8xf32> to vector<1x4xf32>
    %12 = vector.shape_cast %11 : vector<1x4xf32> to vector<1x4x1xf32>
    %13 = vector.broadcast %12 : vector<1x4x1xf32> to vector<1x4x8xf32>
    %14 = arith.subf %10, %13 : vector<1x4x8xf32>
    %15 = math.exp %14 : vector<1x4x8xf32>
    %cst_10 = arith.constant dense<0.000000e+00> : vector<1x4xf32>
    %16 = vector.multi_reduction <add>, %15, %cst_10 [2] : vector<1x4x8xf32> to vector<1x4xf32>
    %17 = vector.shape_cast %16 : vector<1x4xf32> to vector<1x4x1xf32>
    %18 = tpu.reciprocal %17 {approx = true} : vector<1x4x1xf32> -> vector<1x4x1xf32>
    %19 = vector.broadcast %18 : vector<1x4x1xf32> to vector<1x4x8xf32>
    %20 = arith.mulf %15, %19 : vector<1x4x8xf32>
    %c0_11 = arith.constant 0 : index
    %c0_12 = arith.constant 0 : index
    %c0_13 = arith.constant 0 : index
    %21 = vector.load %arg5[%c0_11, %c0_12, %c0_13] : memref<1x4x8xf32, #tpu.memory_space<vmem>>, vector<1x4x8xf32>
    tpu.vector_store %arg5[%c0_11, %c0_12, %c0_13], %20 {strides = array<i32>} : memref<1x4x8xf32, #tpu.memory_space<vmem>>, vector<1x4x8xf32>,
    "tpu.trace_start"() <{level = 10 : i32, message = "bhl,ble->bhe"}> : () -> ()
    %cst_14 = arith.constant dense<0.000000e+00> : vector<1x4x32xf32>
    %22 = tpu.matmul %20, %0, %cst_14 {dimension_numbers = #tpu.dot_dimension_numbers<[2], [1], [1], [2], [0, 0, 0, 1, 1, 2], [0], [0]>} : vector<1x4x8xf32>, vector<1x8x32xf32>, vector<1x4x32xf32> -> vector<1x4x32xf32>
    "tpu.trace_stop"() : () -> ()
    %c0_15 = arith.constant 0 : index
    %c0_16 = arith.constant 0 : index
    %c0_17 = arith.constant 0 : index
    %23 = vector.load %arg4[%c0_15, %c0_16, %c0_17] : memref<1x4x32xf32, #tpu.memory_space<vmem>>, vector<1x4x32xf32>
    tpu.vector_store %arg4[%c0_15, %c0_16, %c0_17], %22 {strides = array<i32>} : memref<1x4x32xf32, #tpu.memory_space<vmem>>, vector<1x4x32xf32>,
    return
  }
  func.func @transform_0(%arg0: i32) -> (i32, i32, i32) {
    %c0_i32 = arith.constant 0 : i32
    %c0_i32_0 = arith.constant 0 : i32
    %c0_i32_1 = arith.constant 0 : i32
    return %arg0, %c0_i32, %c0_i32_0 : i32, i32, i32
  }
  func.func @transform_1(%arg0: i32) -> (i32, i32, i32) {
    %c0_i32 = arith.constant 0 : i32
    %c0_i32_0 = arith.constant 0 : i32
    %c0_i32_1 = arith.constant 0 : i32
    return %arg0, %c0_i32, %c0_i32_0 : i32, i32, i32
  }
  func.func @transform_2(%arg0: i32) -> (i32, i32) {
    %c0_i32 = arith.constant 0 : i32
    %c0_i32_0 = arith.constant 0 : i32
    %c0_i32_1 = arith.constant 0 : i32
    return %c0_i32, %c0_i32_0 : i32, i32
  }
  func.func @transform_3(%arg0: i32) -> (i32, i32, i32) {
    %c0_i32 = arith.constant 0 : i32
    %c0_i32_0 = arith.constant 0 : i32
    %c0_i32_1 = arith.constant 0 : i32
    return %arg0, %c0_i32, %c0_i32_0 : i32, i32, i32
  }
  func.func @transform_4(%arg0: i32) -> (i32, i32, i32) {
    %c0_i32 = arith.constant 0 : i32
    %c0_i32_0 = arith.constant 0 : i32
    %c0_i32_1 = arith.constant 0 : i32
    return %arg0, %c0_i32, %c0_i32_0 : i32, i32, i32
  }
}

</mosaic_0001>

<bundles_post_ra>
// kernel: tpu_custom_call.1
= control target key start
LH: loop header
LB: loop body
LE: loop exit
PB: predicated region body
PF: predicated region fallthrough
CT: control target
= control target key end

     0   :  { %10 = vsyncpa [#allocation3], 0  ;;  %s1013_s0 = inlined_call_operand.hbm [shape: f32[2,8,32], index: 0, kind: input, shape index: {}]   ;;  %s1014_s1 = inlined_call_operand.vmem [shape: f32[2,1,8], index: 1, kind: input, shape index: {}]   ;;  %s1015_s2 = inlined_call_operand.vmem [shape: f32[4,32], index: 2, kind: input, shape index: {}]   ;;  %s1016_s3 = inlined_call_operand.hbm [shape: f32[2,4,32], index: 3, kind: output, shape index: {0}]   ;;  %s1017_s4 = inlined_call_operand.hbm [shape: f32[2,4,8], index: 4, kind: output, shape index: {1}]  }
   0x1   :  { %12 = vsyncpa [#allocation3 + $0x1], 0 }
   0x2   :  { %13 = vsyncpa [#allocation4], 0 }
   0x3   :  { %15 = vsyncpa [#allocation4 + $0x1], 0 }
   0x4   :  { %16 = vsyncpa [#allocation7], 0 }
   0x5   :  { %18 = vsyncpa [#allocation7 + $0x1], 0  ;;  %s809_s15 = smov 0   ;;  %s811_s16 = smov 0  }
   0x6   :  { %s813_s17 = smov 0   ;;  %s815_s18 = smov 0  }
   0x7 LB: > { %s830_s19 = sadd.s32 4294967295, %s776_s18   ;;  %s558_s20 = sadd.s32 4294967294, %s776_s18   ;;  %s776_s18 = sphi %s815_s18, %s1032_s18   ;;  %s772_s17 = sphi %s813_s17, %s1031_s17   ;;  %s768_s16 = sphi %s811_s16, %s1030_s16   ;;  %s764_s15 = sphi %s809_s15, %s1029_s15  }
   0x8   : > { %s834_s21 = sadd.s32 1, %s776_s18   ;;  %s31_s22 = sadd.s32 1, %s772_s17 }
   0x9   : > { %s28_s23 = ssub.s32 %s776_s18, %s834_s21  ;;  %p38_p0 = scmp.ne.s32.totalorder %s772_s17, %s768_s16 }
   0xa   : > { %p29_p1 = scmp.eq.s32.totalorder %s28_s23, 0  ;;  %p39_p2 = scmp.eq.s32.totalorder %s776_s18, 0 }
   0xb   : > { %p44_p3 = scmp.ne.s32.totalorder %s768_s16, %s764_s15  ;;  %p45_p4 = scmp.eq.s32.totalorder %s830_s19, 0 }
   0xc   : > { %s846_s24 = scalar_select %p29_p1, %s772_s17, %s31_s22  }
   0xd   : > { %p848_p5 = por %p39_p2, %p38_p0  ;;  %p852_p6 = por %p45_p4, %p44_p3 }
   0xe   : > { %p115_p7 = scmp.eq.s32.totalorder %s830_s19, 1  ;;  %p121_p8 = scmp.eq.s32.totalorder %s558_s20, 1 }
   0xf   : > { %p607_p10 = scmp.lt.s32.totalorder %s776_s18, 2  ;;  %s170_s29 = sand.u32 1, %s772_s17  }
  0x10   : > { %p859_p11 = por %p115_p7, %p38_p0  ;;  %p863_p12 = por %p121_p8, %p44_p3 }
  0x11   : > { %s562_s30 = sshll.u32 %s776_s18, 7  ;;  %s561_s5 = sshll.u32 %s170_s29, 3 }
  0x12   : > { %s1021_s27 = scalar_select %p859_p11, 1, 0 }
  0x13   : > { %s1022_s28 = scalar_select %p863_p12, 1, 0 }
  0x14   : > { %s872_s8 = scalar_lea.hbm %s1013_s0, %s562_s30  ;;  %s174_s9 = scalar_lea.vmem [#allocation2], %s561_s5 }
  0x15   : > { %s181_s10 = sshll.u32 %s174_s9, 4  ;;  %p876_p13 = pnand %p607_p10, %p848_p5  ;;  %s880_s10 = int_to_ptr.vmem [resolvable:$true] %s181_s10 }
  0x16   : > { %s171_s12 = scalar_lea.sflag [#allocation3], %s170_s29  ;;  %s648_s13 = scalar_lea.hbm %s872_s8, 128 }
  0x17   : > { %p649_p2 = scmp.ne.s32.totalorder %s872_s8, %s648_s13  ;;  %p650_p3 = pneg %p876_p13 }
  0x18   : > { %s653_s22 = scalar_lea.hbm %s1013_s0, 256  ;;  %p654_p5 = scmp.lt.u32.totalorder %s872_s8, %s1013_s0 }
  0x19   : > { %p651_p4 = pnand %p650_p3, %p649_p2  ;;  %p655_p8 = scmp.lt.u32.totalorder %s653_s22, %s648_s13 }
  0x1a   : > { %p657_p9 = scmp.lt.u32.totalorder %s648_s13, %s872_s8 }
  0x1b   : > { %p652_p7 = pneg %p651_p4  ;;  %p656_p10 = por %p655_p8, %p654_p5 }
  0x1d   : > { %p658_p0 = por %p657_p9, %p656_p10 }
  0x1f   : > { %p659_p1 = pnand %p658_p0, %p652_p7 }
  0x21   : > { %662 = shalt.err (!%p659_p1)
}
  0x22   : > { %s663_s29 = scalar_lea.vmem %s880_s10, 128  ;;  %s778_s30 = smov [#allocation2]  }
  0x23   : > { %p664_p2 = scmp.ne.s32.totalorder %s880_s10, %s663_s29  ;;  %s668_s5 = sshll.u32 %s778_s30, 4  ;;  %s669_s5 = int_to_ptr.vmem [resolvable:$false] %s668_s5 }
  0x24   : > { %s670_s6 = scalar_lea.vmem %s669_s5, 256  ;;  %p671_p11 = scmp.lt.s32.totalorder %s880_s10, %s669_s5 }
  0x25   : > { %p666_p4 = pnand %p664_p2, %p650_p3  ;;  %p672_p5 = scmp.lt.s32.totalorder %s670_s6, %s663_s29 }
  0x27   : > { %p667_p12 = pneg %p666_p4  ;;  %p673_p8 = por %p672_p5, %p671_p11 }
  0x29   : > { %p674_p9 = pnand %p673_p8, %p667_p12 }
  0x2b   : > { %677 = shalt.err (!%p674_p9)
}
  0x2c   : > { %599 = dma.hbm_to_vmem [thread:$0]  (!%p876_p13), %s872_s8, 128, %s880_s10, %s171_s12  }
  0x2d   : > { %p1024_p0 = scmp.lt.s32.totalorder %s776_s18, 3  ;;  %p1025_p1 = scmp.ge.s32.totalorder %s776_s18, 1 }
  0x2f   : > { %p193_p3 = pnand %p1025_p1, %p1024_p0 }
  0x30   : > { %s914_s7 = sand.u32 (!%p193_p3), 1, %s768_s16  }
  0x31   : > { %196 = sbr.rel (%p193_p3) target bundleno = 816 (0x330), region = 32  ;;  %s564_s9 = sshll.u32 (!%p193_p3), %s914_s7, 3 }
  0x32   : > { %s199_s13 = scalar_lea.sflag (!%p193_p3), [#allocation3], %s914_s7  ;;  %s202_s14 = scalar_lea.vmem (!%p193_p3), [#allocation2], %s564_s9 }
  0x38   : > { %751 = dma.done.wait (%p852_p6), %s199_s13, 128  }
  0x39   : > { %753 = vsyncadd (%p852_p6), %s199_s13, 4294967168  ;;  %v779_v0 = vmov 0.0   ;;  %vm780_vm0 = vmmov 0   ;;  %vm241_vm1 = vcmask 261120   ;;  %v238_v1 = vld [vmem:[%s202_s14] sm:$0xff]  ;;  %p235_p11 = scmp.lt.s32.totalorder %s830_s19, 1  ;;  %v320_v3 = vlaneseq }
  0x3a   : > { %580 = vmatprep.subr.mxu0 %v779_v0  ;;  %582 = vmatprep.mubr.msk.f32.mxu0 %vm780_vm0, %v779_v0  ;;  %v240_v2 = vld [vmem:[%s1015_s2] sm:$0xf]  ;;  %v781_v7 = vmov 0   ;;  %vm326_vm4 = vcmask 60416   ;;  %s565_s22 = sshll.u32 %s914_s7, 2  ;;  %vm339_vm5 = vcmask 64512  }
  0x3b   : > { %585 = vmatprep.subr.mxu1 %v779_v0  ;;  %587 = vmatprep.mubr.msk.f32.mxu1 %vm780_vm0, %v779_v0  ;;  %s236_s26 = scalar_select %p235_p11, %s830_s19, 1  ;;  %v321_v5 = vshrl.u32 %v320_v3, 7 }
  0x3c   : > { %581 = vmatpush3.xpose.msk.msra.mxu0 %vm241_vm1, %v238_v1  ;;  %586 = vmatpush3.msra.mxu1 %v238_v1  ;;  %s234_s23 = scalar_lea.vmem [#allocation6], %s565_s22  ;;  %s572_s25 = sshll.u32 %s830_s19, 6 }
  0x3d   : > { %s237_s20 = scalar_lea.vmem %s1014_s1, %s236_s26  ;;  %v322_v6 = vsub.s32 0, %v321_v5  ;;  %s942_s5 = scalar_lea.hbm %s1017_s4, %s572_s25 }
  0x3e   : > { %v239_v4 = vld [vmem:[%s237_s20] sm:$0x1]  ;;  %s447_s6 = sshll.u32 %s234_s23, 4  ;;  %s421_s9 = scalar_lea.sflag [#allocation7], %s914_s7  ;;  %s448_s6 = int_to_ptr.vmem [resolvable:$true] %s447_s6 }
  0x3f   : > { %583 = vmatmul.mubr.msk.f32.vlgmr.msra.gmra.mrb[0].mxu0 %vm241_vm1, %v240_v2  ;;  %vm318_vm2 = vcmp.gt.f32.partialorder %v239_v4, 0.5  ;;  %s678_s13 = scalar_lea.vmem %s448_s6, 64  ;;  %p1026_p12 = scmp.ne.s32.totalorder %s1021_s27, 0 }
  0x40   : > { %v319_v8 = vsel %vm318_vm2, 1, %v781_v7  ;;  %p679_p6 = scmp.ne.s32.totalorder %s448_s6, %s678_s13  ;;  %s782_s14 = smov [#allocation6]  }
  0x41   : > { %v323_v9 = vrot.slane %v319_v8, %v322_v6  ;;  %s682_s8 = sshll.u32 %s782_s14, 4  ;;  %s683_s8 = int_to_ptr.vmem [resolvable:$false] %s682_s8 }
  0x42   : > { %p680_p13 = pnand %p679_p6, %p1026_p12  ;;  %s684_s10 = scalar_lea.vmem %s683_s8, 128 }
  0x43   : > { %vm324_vm3 = vcmp.eq.s32.totalorder %v323_v9, 1  ;;  %p685_p10 = scmp.lt.s32.totalorder %s448_s6, %s683_s8  ;;  %p686_p2 = scmp.lt.s32.totalorder %s684_s10, %s678_s13 }
  0x44   : > { %p681_p7 = pneg %p680_p13 }
  0x45   : > { %p687_p4 = por %p686_p2, %p685_p10 }
  0x47   : > { %p688_p5 = pnand %p687_p4, %p681_p7 }
 0x112   : > { %v314_v10 = vpop.f32.mrb[0].mxu0 }
 0x113   : > { %v325_v11 = vsel %vm324_vm3, %v314_v10, -1e+09  ;;  %v584_v12 = vpop.f32.mrb[1].mxu0 }
 0x114   : > { %v327_v13 = vsel %vm326_vm4, %v325_v11, -inf }
 0x115   : > { %328 = vmax.xlane.f32.xlu0 %v327_v13 }
 0x1a2   : > { %v329_v14 = vpop.xlane.xlu0 %328 }
 0x1a3   : > { %v330_v15 = vsub.f32 %v325_v11, %v329_v14 }
 0x1a5   : > { %v331_v16 = vmul.f32 1.442695, %v330_v15 }
 0x1a7   : > { %644 = vpow2.f32 %v331_v16 }
 0x1b1   : > { %v645_v17 = vpop.eup %644 }
 0x1b2   : > { %v333_v18 = vsel %vm326_vm4, %v645_v17, 0.0 }
 0x1b3   : > { %334 = vadd.xlane.f32.xlu0 %v333_v18 }
 0x240   : > { %v335_v19 = vpop.xlane.xlu0 %334 }
 0x241   : > { %646 = vrcp.f32 %v335_v19 }
 0x24b   : > { %v647_v20 = vpop.eup %646 }
 0x24c   : > { %v337_v21 = vmul.f32 %v647_v20, %v645_v17 }
 0x24e   : > { %588 = vmatmul.mubr.msk.f32.vlgmr.msra.gmra.mrb[0].mxu1 %vm339_vm5, %v337_v21  ;;  %338 = vst.msk [vmem:[%s234_s23] sm:$0xf] %vm326_vm4, %v337_v21 }
 0x24f   : > { %691 = shalt.err (!%p688_p5)
}
 0x250   : > { %s692_s26 = scalar_lea.hbm %s942_s5, 64  ;;  %s696_s20 = scalar_lea.hbm %s1017_s4, 128 }
 0x251   : > { %p693_p8 = scmp.ne.s32.totalorder %s942_s5, %s692_s26  ;;  %p697_p1 = scmp.lt.u32.totalorder %s942_s5, %s1017_s4 }
 0x252   : > { %p698_p3 = scmp.lt.u32.totalorder %s696_s20, %s692_s26  ;;  %p700_p6 = scmp.lt.u32.totalorder %s692_s26, %s942_s5 }
 0x253   : > { %p694_p9 = pnand %p693_p8, %p1026_p12 }
 0x254   : > { %p699_p11 = por %p698_p3, %p697_p1 }
 0x255   : > { %p695_p0 = pneg %p694_p9 }
 0x256   : > { %p701_p13 = por %p700_p6, %p699_p11 }
 0x258   : > { %p702_p7 = pnand %p701_p13, %p695_p0 }
 0x25a   : > { %705 = shalt.err (!%p702_p7)
}
 0x25b   : > { %593 = dma.vmem_to_hbm [thread:$0]  (%p1026_p12), %s448_s6, 64, %s942_s5, %s421_s9   ;;  %vm413_vm6 = vcmask 257024  }
 0x25c   : > { %s227_s30 = scalar_lea.vmem [#allocation5], %s565_s22  ;;  %s969_s10 = scalar_lea.hbm %s1016_s3, %s572_s25 }
 0x25d   : > { %s434_s13 = sshll.u32 %s227_s30, 4  ;;  %s416_s26 = scalar_lea.sflag [#allocation4], %s914_s7  ;;  %s971_s13 = int_to_ptr.vmem [resolvable:$true] %s434_s13 }
 0x25e   : > { %s706_s5 = scalar_lea.vmem %s971_s13, 64  ;;  %s783_s19 = smov [#allocation5]  }
 0x25f   : > { %p707_p10 = scmp.ne.s32.totalorder %s971_s13, %s706_s5  ;;  %s710_s22 = sshll.u32 %s783_s19, 4  ;;  %s711_s22 = int_to_ptr.vmem [resolvable:$false] %s710_s22 }
 0x260   : > { %s712_s6 = scalar_lea.vmem %s711_s22, 128  ;;  %p713_p5 = scmp.lt.s32.totalorder %s971_s13, %s711_s22 }
 0x261   : > { %p708_p2 = pnand %p707_p10, %p1026_p12  ;;  %p714_p8 = scmp.lt.s32.totalorder %s712_s6, %s706_s5 }
 0x263   : > { %p709_p4 = pneg %p708_p2  ;;  %p715_p9 = por %p714_p8, %p713_p5 }
 0x265   : > { %p716_p0 = pnand %p715_p9, %p709_p4 }
 0x321   : > { %v409_v22 = vpop.f32.mrb[0].mxu1 }
 0x322   : > { %414 = vst.msk [vmem:[%s227_s30] sm:$0xf] %vm413_vm6, %v409_v22  ;;  %v589_v23 = vpop.f32.mrb[1].mxu1 }
 0x323   : > { %719 = shalt.err (!%p716_p0)
}
 0x324   : > { %s720_s7 = scalar_lea.hbm %s969_s10, 64  ;;  %s724_s11 = scalar_lea.hbm %s1016_s3, 128 }
 0x325   : > { %p721_p1 = scmp.ne.s32.totalorder %s969_s10, %s720_s7  ;;  %p725_p6 = scmp.lt.u32.totalorder %s969_s10, %s1016_s3 }
 0x326   : > { %p726_p13 = scmp.lt.u32.totalorder %s724_s11, %s720_s7  ;;  %p728_p10 = scmp.lt.u32.totalorder %s720_s7, %s969_s10 }
 0x327   : > { %p722_p3 = pnand %p721_p1, %p1026_p12 }
 0x328   : > { %p727_p7 = por %p726_p13, %p725_p6 }
 0x329   : > { %p723_p11 = pneg %p722_p3 }
 0x32a   : > { %p729_p2 = por %p728_p10, %p727_p7 }
 0x32c   : > { %p730_p4 = pnand %p729_p2, %p723_p11 }
 0x32e   : > { %733 = shalt.err (!%p730_p4)
}
 0x32f   : > { %592 = dma.vmem_to_hbm [thread:$0]  (%p1026_p12), %s971_s13, 64, %s969_s10, %s416_s26  }
 0x330 PF: > { %s459_s23 = sand.u32 1, %s764_s15   ;;  %p1027_p5 = scmp.ne.s32.totalorder %s1022_s28, 0 }
 0x331   : > { %p1028_p8 = scmp.ge.s32.totalorder %s776_s18, 2  ;;  %s460_s29 = scalar_lea.sflag [#allocation4], %s459_s23 }
 0x333   : > { %p601_p9 = pnand %p1028_p8, %p1027_p5 }
 0x335   : > { %755 = dma.done.wait (!%p601_p9), %s460_s29, 64  }
 0x336   : > { %757 = vsyncadd (!%p601_p9), %s460_s29, 4294967232  ;;  %s469_s30 = scalar_lea.sflag [#allocation7], %s459_s23 }
 0x337   : > { %759 = dma.done.wait (!%p601_p9), %s469_s30, 64  }
 0x338   : > { %761 = vsyncadd (!%p601_p9), %s469_s30, 4294967232  ;;  %p21_p12 = scmp.ge.s32.totalorder %s834_s21, 4   ;;  %s1029_s15 = smov %s768_s16 }
 0x339   : > { %s1030_s16 = smov %s772_s17  ;;  %s1031_s17 = smov %s846_s24 }
 0x33a   : > { %s1032_s18 = smov %s834_s21  ;;  %23 = sbr.rel (!%p21_p12) target bundleno = 7 (0x7), region = 97 }
 0x341   :  { %474 = vsyncpa [#allocation3], 1 }
 0x342   :  { %476 = vsyncpa [#allocation3 + $0x1], 1 }
 0x343   :  { %477 = vsyncpa [#allocation4], 1 }
 0x344   :  { %479 = vsyncpa [#allocation4 + $0x1], 1 }
 0x345   :  { %480 = vsyncpa [#allocation7], 1 }
 0x346   :  { %482 = vsyncpa [#allocation7 + $0x1], 1 }

</bundles_post_ra>
